<compile_context>
chip_gen: v7x
topology: tpu7x:2x2x1
jax: 0.10.0
libtpu: 0.0.40
codegen_flags: <defaults>
</compile_context>

<pallas_src>
import functools
import math

import jax
import jax.numpy as jnp
from jax.experimental import pallas as pl
from jax.experimental.pallas import tpu as pltpu


def _round_up(x, m):
    return ((x + m - 1) // m) * m


# ---------------------------------------------------------------------------
# Kernel 1: h = x @ W (with ones column), s_src = h·a1, s_dst = h·a2.
# ---------------------------------------------------------------------------
def precompute_kernel(x_ref, w_ref, a1_ref, a2_ref,
                      h_ref, ssrc_ref, sdst_ref, *, ones_col):
    h = jnp.dot(x_ref[...], w_ref[...], preferred_element_type=jnp.float32)
    # Per-node attention scores: VPU mul + lane reduce, once per row tile, so
    # the attention loop never re-reduces over features or transposes.
    ssrc_ref[...] = jnp.sum(h * a1_ref[...], axis=-1, keepdims=True)   # [Tn,1]
    sdst_ref[...] = jnp.sum(h * a2_ref[...], axis=-1, keepdims=True)   # [Tn,1]
    # Rowsum-via-matmul trick: plant 1.0 in a zero-padded feature column of h.
    # a1/a2 are zero in that column, so the scores above are unaffected, and
    # acc[:, ones_col] of kernel 2 becomes exactly the e-rowsum for free.
    col = jax.lax.broadcasted_iota(jnp.int32, h.shape, 1)
    h = jnp.where(col == ones_col, 1.0, h)
    h_ref[...] = h.astype(h_ref.dtype)


# ---------------------------------------------------------------------------
# Kernel 2: tiled masked attention + aggregation.
#   grid = (num_row_tiles [parallel], num_col_tiles [arbitrary / reduction])
# ---------------------------------------------------------------------------
def spgat_kernel(tmask_ref, ssrc_ref, h_j_ref, sdst_ref, adj_ref, out_ref,
                 acc_sc, *, alpha, concat, rowsum_col, mm_dtype):
    i = pl.program_id(0)
    j = pl.program_id(1)

    @pl.when(j == 0)
    def _init():
        acc_sc[...] = jnp.zeros_like(acc_sc)

    # Skip adjacency tiles that contain no edges at all (tile-level sparsity).
    @pl.when(tmask_ref[i, j] != 0)
    def _compute():
        # e[i,j] = exp(-leaky_relu(a1·h_i + a2·h_j)), restricted to edges.
        # NOTE: like the PyTorch reference there is no max-subtraction, so very
        # negative logits can overflow exp; masked entries are zeroed below.
        logits = ssrc_ref[...] + sdst_ref[...]       # [Ti,1] + [1,Tj] -> [Ti,Tj]
        lrelu = jnp.where(logits > 0, logits, alpha * logits)
        e = jnp.exp(-lrelu)
        e = jnp.where(adj_ref[...] != 0, e, 0.0)     # int8 mask, no f32 convert

        # TODO(synk): dropout on edge_e omitted (eval-mode identity); a training
        # variant would mask with pltpu.prng_random_bits and rescale by 1/(1-p).

        # Single MXU matmul: the ones column of h_j makes acc[:, rowsum_col]
        # the e-rowsum, so numerator and denominator use the same bf16 e.
        acc_sc[...] += jnp.dot(e.astype(mm_dtype), h_j_ref[...],
                               preferred_element_type=jnp.float32)

    @pl.when(j == pl.num_programs(1) - 1)
    def _finalize():
        acc = acc_sc[...]
        rs = acc[:, rowsum_col:rowsum_col + 1]       # e-rowsum column  [Ti,1]
        # Guard zero-degree (and padded) rows instead of producing 0/0 = NaN;
        # approx reciprocal goes to the otherwise-idle EUP slot.
        inv = pl.reciprocal(jnp.where(rs > 0.0, rs, 1.0), approx=True)
        hp = acc * inv
        if concat:
            hp = jnp.where(hp > 0, hp, jnp.exp(hp) - 1.0)   # ELU
        out_ref[...] = hp.astype(out_ref.dtype)


# ---------------------------------------------------------------------------
# Wrapper
# ---------------------------------------------------------------------------
def sp_graph_attention_layer(x, adj, W, a, *, alpha=0.2, concat=True,
                             use_bf16_matmul=True):
    """Forward pass of SpGraphAttentionLayer. x: [N, Fin], adj: [N, N] -> [N, Fout]."""
    N, fin = x.shape
    fout = W.shape[1]

    # ---- tile / padding choices ------------------------------------------
    # Fout is zero-padded to 128 lanes (with >= 1 spare column reserved for the
    # ones/rowsum trick) so every vreg and the output store are lane-dense.
    fp = _round_up(fout + 1, 128)
    ones_col = fout

    npad128 = _round_up(N, 128)
    if npad128 <= 1024:
        # Whole (padded) graph in one tile pair.
        ti = tj = npad = npad128
    else:
        # Large tiles: per-step MXU/VPU work is thousands of cycles, so the
        # ~0.35us pipeline overhead is amortized and h_j HBM re-read traffic
        # (prop. to N/ti passes over h) is cut.  ti=512 keeps >=2 row tiles for
        # medium graphs so v7x's two TensorCores both get work on the
        # "parallel" axis.  Worst-case double-buffered VMEM at (512, 4096):
        # adj int8 2 MiB x2 + h_j bf16 1 MiB x2 + out/acc ~0.5 MiB  -> ~7 MiB.
        ti = 512
        tj = min(4096, _round_up(npad128, ti))
        npad = _round_up(N, tj)

    f32 = jnp.float32
    h_dtype = jnp.bfloat16 if use_bf16_matmul else f32

    xp = jnp.zeros((npad, fin), f32).at[:N, :].set(x.astype(f32))
    Wp = jnp.zeros((fin, fp), f32).at[:, :fout].set(W.astype(f32))
    a1p = jnp.zeros((1, fp), f32).at[:, :fout].set(a[:, :fout].astype(f32))
    a2p = jnp.zeros((1, fp), f32).at[:, :fout].set(a[:, fout:].astype(f32))
    adjp = jnp.zeros((npad, npad), jnp.int8).at[:N, :N].set(
        (adj != 0).astype(jnp.int8))

    # 48 MiB: ample for these tiles, still leaves headroom under v7x's 64 MiB
    # physical VMEM and is far below v5e/v6e's 128 MiB.
    vmem_limit = 48 * 1024 * 1024

    # ---- kernel 1: h (+ ones column), s_src [N,1], s_dst [N,1] -------------
    k1 = functools.partial(precompute_kernel, ones_col=ones_col)
    h, s_src, s_dst_col = pl.pallas_call(
        k1,
        out_shape=(jax.ShapeDtypeStruct((npad, fp), h_dtype),
                   jax.ShapeDtypeStruct((npad, 1), f32),
                   jax.ShapeDtypeStruct((npad, 1), f32)),
        grid_spec=pltpu.PrefetchScalarGridSpec(
            num_scalar_prefetch=0,
            grid=(npad // ti,),
            in_specs=[
                pl.BlockSpec((ti, fin), lambda i: (i, 0)),   # x rows
                pl.BlockSpec((fin, fp), lambda i: (0, 0)),   # W (resident)
                pl.BlockSpec((1, fp), lambda i: (0, 0)),     # a1 row vector
                pl.BlockSpec((1, fp), lambda i: (0, 0)),     # a2 row vector
            ],
            out_specs=[
                pl.BlockSpec((ti, fp), lambda i: (i, 0)),    # h rows
                pl.BlockSpec((ti, 1), lambda i: (i, 0)),     # s_src
                pl.BlockSpec((ti, 1), lambda i: (i, 0)),     # s_dst (column)
            ],
        ),
        compiler_params=pltpu.CompilerParams(
            dimension_semantics=("parallel",),
            vmem_limit_bytes=vmem_limit,
        ),
    )(xp, Wp, a1p, a2p)

    # Lane-major destination scores for the broadcast in kernel 2 (cheap XLA
    # reshape outside the kernel; avoids any in-kernel transpose).
    s_dst = s_dst_col.reshape(1, npad)

    # Per-(i,j)-tile nonzero flags so kernel 2 skips fully-empty adj tiles.
    n_i, n_j = npad // ti, npad // tj
    tile_mask = jnp.any(
        adjp.reshape(n_i, ti, n_j, tj) != 0, axis=(1, 3)).astype(jnp.int32)

    # ---- kernel 2: tiled masked attention + aggregation --------------------
    kernel = functools.partial(spgat_kernel, alpha=alpha, concat=concat,
                               rowsum_col=ones_col, mm_dtype=h_dtype)

    out_p = pl.pallas_call(
        kernel,
        out_shape=jax.ShapeDtypeStruct((npad, fp), f32),
        grid_spec=pltpu.PrefetchScalarGridSpec(
            num_scalar_prefetch=1,                 # tile_mask -> SMEM
            grid=(n_i, n_j),
            in_specs=[
                pl.BlockSpec((ti, 1), lambda i, j, m: (i, 0)),    # s_src block
                pl.BlockSpec((tj, fp), lambda i, j, m: (j, 0)),   # h (neighbors)
                pl.BlockSpec((1, tj), lambda i, j, m: (0, j)),    # s_dst slice
                pl.BlockSpec((ti, tj), lambda i, j, m: (i, j)),   # adj tile int8
            ],
            out_specs=pl.BlockSpec((ti, fp), lambda i, j, m: (i, 0)),
            scratch_shapes=[
                pltpu.VMEM((ti, fp), jnp.float32),   # e @ h accumulator (f32)
            ],
        ),
        compiler_params=pltpu.CompilerParams(
            dimension_semantics=("parallel", "arbitrary"),
            vmem_limit_bytes=vmem_limit,
        ),
    )(tile_mask, s_src, h, s_dst, adjp)

    return out_p[:N, :fout].astype(x.dtype)


# ---------------------------------------------------------------------------
# Pure-JAX reference (mirrors the PyTorch module, eval mode)
# ---------------------------------------------------------------------------
def _ref_spgat(x, adj, W, a, alpha, concat):
    h = x @ W
    fo = W.shape[1]
    s_src = h @ a[0, :fo]
    s_dst = h @ a[0, fo:]
    logits = s_src[:, None] + s_dst[None, :]
    lrelu = jnp.where(logits > 0, logits, alpha * logits)
    e = jnp.where(adj != 0, jnp.exp(-lrelu), 0.0)
    rowsum = jnp.sum(e, axis=1, keepdims=True)
    hp = (e @ h) / rowsum
    if concat:
        hp = jnp.where(hp > 0, hp, jnp.exp(hp) - 1.0)
    return hp


if __name__ == "__main__":
    key = jax.random.PRNGKey(0)
    N, in_features, out_features = 64, 32, 16
    alpha = 0.2

    k_x, k_w, k_a, k_adj = jax.random.split(key, 4)

    # node features
    x = jax.random.normal(k_x, (N, in_features), dtype=jnp.float32)

    # parameters, xavier_normal_ with gain=1.414 (std = gain * sqrt(2/(fan_in+fan_out)))
    std_W = 1.414 * math.sqrt(2.0 / (in_features + out_features))
    W = std_W * jax.random.normal(k_w, (in_features, out_features), dtype=jnp.float32)
    std_a = 1.414 * math.sqrt(2.0 / (1 + 2 * out_features))
    a = std_a * jax.random.normal(k_a, (1, 2 * out_features), dtype=jnp.float32)

    # random sparse 0/1 adjacency with self-loops (every row has >= 1 edge,
    # matching the assumption the PyTorch module needs to avoid NaNs)
    adj = (jax.random.uniform(k_adj, (N, N)) < 0.2).astype(jnp.float32)
    adj = jnp.maximum(adj, jnp.eye(N, dtype=jnp.float32))

    out = sp_graph_attention_layer(x, adj, W, a, alpha=alpha, concat=True)
    out = jax.block_until_ready(out)

    assert out.shape == (N, out_features)
    assert not bool(jnp.isnan(out).any())

    ref = _ref_spgat(x, adj, W, a, alpha, True)
    max_err = float(jnp.max(jnp.abs(out - ref)))
    # bf16 aggregation + approx reciprocal => loose tolerance vs f32 reference
    assert max_err < 5e-2, f"max abs error {max_err}"
    print("KERNEL_OK")
</pallas_src>

<mosaic_0001>
module attributes {stable_mosaic.version = 11 : i64} {
  func.func @precompute_kernel(%arg0: i32, %arg1: memref<128x32xf32, #tpu.memory_space<vmem>>, %arg2: memref<32x128xf32, #tpu.memory_space<vmem>>, %arg3: memref<1x128xf32, #tpu.memory_space<vmem>>, %arg4: memref<1x128xf32, #tpu.memory_space<vmem>>, %arg5: memref<128x128xbf16, #tpu.memory_space<vmem>>, %arg6: memref<128x1xf32, #tpu.memory_space<vmem>>, %arg7: memref<128x1xf32, #tpu.memory_space<vmem>>) attributes {dimension_semantics = [#tpu.dimension_semantics<parallel>], iteration_bounds = array<i64: 1>, scalar_prefetch = 0 : i64, scratch_operands = 0 : i64, tpu.core_type = #tpu.core_type<tc>, window_params = [{transform_indices = @transform_0, window_bounds = array<i64: 128, 32>}, {pipeline_mode = #tpu.pipeline_mode<synchronous>, transform_indices = @transform_1, window_bounds = array<i64: 32, 128>}, {pipeline_mode = #tpu.pipeline_mode<synchronous>, transform_indices = @transform_2, window_bounds = array<i64: 1, 128>}, {pipeline_mode = #tpu.pipeline_mode<synchronous>, transform_indices = @transform_3, window_bounds = array<i64: 1, 128>}, {transform_indices = @transform_4, window_bounds = array<i64: 128, 128>}, {transform_indices = @transform_5, window_bounds = array<i64: 128, 1>}, {transform_indices = @transform_6, window_bounds = array<i64: 128, 1>}]} {
    %c0 = arith.constant 0 : index
    %c0_0 = arith.constant 0 : index
    %0 = vector.load %arg1[%c0, %c0_0] : memref<128x32xf32, #tpu.memory_space<vmem>>, vector<128x32xf32>
    %c0_1 = arith.constant 0 : index
    %c0_2 = arith.constant 0 : index
    %1 = vector.load %arg2[%c0_1, %c0_2] : memref<32x128xf32, #tpu.memory_space<vmem>>, vector<32x128xf32>
    %cst = arith.constant dense<0.000000e+00> : vector<128x128xf32>
    %2 = tpu.matmul %0, %1, %cst {dimension_numbers = #tpu.dot_dimension_numbers<[1], [0], [0], [1], [0, 0, 1, 1], [], []>} : vector<128x32xf32>, vector<32x128xf32>, vector<128x128xf32> -> vector<128x128xf32>
    %c0_3 = arith.constant 0 : index
    %c0_4 = arith.constant 0 : index
    %3 = vector.load %arg3[%c0_3, %c0_4] : memref<1x128xf32, #tpu.memory_space<vmem>>, vector<1x128xf32>
    %4 = vector.broadcast %3 : vector<1x128xf32> to vector<128x128xf32>
    %5 = arith.mulf %2, %4 : vector<128x128xf32>
    %cst_5 = arith.constant dense<0.000000e+00> : vector<128xf32>
    %6 = vector.multi_reduction <add>, %5, %cst_5 [1] : vector<128x128xf32> to vector<128xf32>
    %7 = vector.shape_cast %6 : vector<128xf32> to vector<128x1xf32>
    %c0_6 = arith.constant 0 : index
    %c0_7 = arith.constant 0 : index
    %8 = vector.load %arg6[%c0_6, %c0_7] : memref<128x1xf32, #tpu.memory_space<vmem>>, vector<128x1xf32>
    tpu.vector_store %arg6[%c0_6, %c0_7], %7 {strides = array<i32>} : memref<128x1xf32, #tpu.memory_space<vmem>>, vector<128x1xf32>,
    %c0_8 = arith.constant 0 : index
    %c0_9 = arith.constant 0 : index
    %9 = vector.load %arg4[%c0_8, %c0_9] : memref<1x128xf32, #tpu.memory_space<vmem>>, vector<1x128xf32>
    %10 = vector.broadcast %9 : vector<1x128xf32> to vector<128x128xf32>
    %11 = arith.mulf %2, %10 : vector<128x128xf32>
    %cst_10 = arith.constant dense<0.000000e+00> : vector<128xf32>
    %12 = vector.multi_reduction <add>, %11, %cst_10 [1] : vector<128x128xf32> to vector<128xf32>
    %13 = vector.shape_cast %12 : vector<128xf32> to vector<128x1xf32>
    %c0_11 = arith.constant 0 : index
    %c0_12 = arith.constant 0 : index
    %14 = vector.load %arg7[%c0_11, %c0_12] : memref<128x1xf32, #tpu.memory_space<vmem>>, vector<128x1xf32>
    tpu.vector_store %arg7[%c0_11, %c0_12], %13 {strides = array<i32>} : memref<128x1xf32, #tpu.memory_space<vmem>>, vector<128x1xf32>,
    %15 = tpu.iota {dimensions = array<i32: 1>} : vector<128x128xi32>
    %c16_i32 = arith.constant 16 : i32
    %16 = vector.broadcast %c16_i32 : i32 to vector<128x128xi32>
    %17 = arith.cmpi eq, %15, %16 : vector<128x128xi32>
    %cst_13 = arith.constant 1.000000e+00 : f32
    %18 = vector.broadcast %cst_13 : f32 to vector<128x128xf32>
    %19 = arith.select %17, %18, %2 : vector<128x128xi1>, vector<128x128xf32>
    %20 = arith.truncf %19 : vector<128x128xf32> to vector<128x128xbf16>
    %c0_14 = arith.constant 0 : index
    %c0_15 = arith.constant 0 : index
    %21 = vector.load %arg5[%c0_14, %c0_15] : memref<128x128xbf16, #tpu.memory_space<vmem>>, vector<128x128xbf16>
    tpu.vector_store %arg5[%c0_14, %c0_15], %20 {strides = array<i32>} : memref<128x128xbf16, #tpu.memory_space<vmem>>, vector<128x128xbf16>,
    return
  }
  func.func @transform_0(%arg0: i32) -> (i32, i32) {
    %c0_i32 = arith.constant 0 : i32
    %c0_i32_0 = arith.constant 0 : i32
    return %arg0, %c0_i32 : i32, i32
  }
  func.func @transform_1(%arg0: i32) -> (i32, i32) {
    %c0_i32 = arith.constant 0 : i32
    %c0_i32_0 = arith.constant 0 : i32
    %c0_i32_1 = arith.constant 0 : i32
    return %c0_i32, %c0_i32_0 : i32, i32
  }
  func.func @transform_2(%arg0: i32) -> (i32, i32) {
    %c0_i32 = arith.constant 0 : i32
    %c0_i32_0 = arith.constant 0 : i32
    %c0_i32_1 = arith.constant 0 : i32
    return %c0_i32, %c0_i32_0 : i32, i32
  }
  func.func @transform_3(%arg0: i32) -> (i32, i32) {
    %c0_i32 = arith.constant 0 : i32
    %c0_i32_0 = arith.constant 0 : i32
    %c0_i32_1 = arith.constant 0 : i32
    return %c0_i32, %c0_i32_0 : i32, i32
  }
  func.func @transform_4(%arg0: i32) -> (i32, i32) {
    %c0_i32 = arith.constant 0 : i32
    %c0_i32_0 = arith.constant 0 : i32
    return %arg0, %c0_i32 : i32, i32
  }
  func.func @transform_5(%arg0: i32) -> (i32, i32) {
    %c0_i32 = arith.constant 0 : i32
    %c0_i32_0 = arith.constant 0 : i32
    return %arg0, %c0_i32 : i32, i32
  }
  func.func @transform_6(%arg0: i32) -> (i32, i32) {
    %c0_i32 = arith.constant 0 : i32
    %c0_i32_0 = arith.constant 0 : i32
    return %arg0, %c0_i32 : i32, i32
  }
}

</mosaic_0001>

<bundles_post_ra>
// kernel: tpu_custom_call.1
= control target key start
LH: loop header
LB: loop body
LE: loop exit
PB: predicated region body
PF: predicated region fallthrough
CT: control target
= control target key end

     0   :  { %vm41_vm0 = vcmask 261120   ;;  %s1001_s0 = inlined_call_operand.vmem [shape: f32[128,32], index: 0, kind: input, shape index: {}]   ;;  %s1002_s1 = inlined_call_operand.vmem [shape: f32[32,128], index: 1, kind: input, shape index: {}]   ;;  %s1003_s2 = inlined_call_operand.vmem [shape: f32[1,128], index: 2, kind: input, shape index: {}]   ;;  %s1004_s3 = inlined_call_operand.vmem [shape: f32[1,128], index: 3, kind: input, shape index: {}]   ;;  %s1005_s4 = inlined_call_operand.hbm [shape: bf16[128,128], index: 4, kind: output, shape index: {0}]   ;;  %s1006_s5 = inlined_call_operand.vmem [shape: f32[128,1], index: 5, kind: output, shape index: {1}]   ;;  %s1007_s6 = inlined_call_operand.vmem [shape: f32[128,1], index: 6, kind: output, shape index: {2}]  }
   0x1   :  { %v37_v0 = vld [vmem:[%s1002_s1] sm:$0xff]  ;;  %v38_v1 = vld [vmem:[%s1002_s1 + $0x8] sm:$0xff]  ;;  %v39_v2 = vld [vmem:[%s1002_s1 + $0x10] sm:$0xff] }
   0x2   :  { %v650_v3 = vpack.c.bf16 %v38_v1, %v37_v0  ;;  %v40_v4 = vld [vmem:[%s1002_s1 + $0x18] sm:$0xff]  ;;  %v21_v5 = vld [vmem:[%s1001_s0] sm:$0xff] }
   0x3   :  { %v29_v6 = vld [vmem:[%s1001_s0 + $0x40] sm:$0xff]  ;;  %v654_v7 = vpack.c.bf16 %v40_v4, %v39_v2  ;;  %626 = vmatprep.mubr.msk.f32.mxu0 %vm41_vm0, %v21_v5 }
   0x4   :  { %638 = vmatprep.mubr.msk.f32.mxu1 %vm41_vm0, %v29_v6  ;;  %651 = vmatprep.subr.bf16.mxu0 %v650_v3 }
   0x5   :  { %658 = vmatprep.subr.bf16.mxu1 %v650_v3  ;;  %653 = vmatpush3.bf16.msra.mxu0 %v650_v3 }
   0x6   :  { %660 = vmatpush3.bf16.msra.mxu1 %v650_v3  ;;  %655 = vmatprep.subr.bf16.mxu0 %v654_v7 }
   0x7   :  { %659 = vmatprep.subr.bf16.mxu1 %v654_v7 }
   0x8   :  { %12 = vsyncpa [#allocation3], 0  ;;  %v22_v8 = vld [vmem:[%s1001_s0 + $0x8] sm:$0xff]  ;;  %v23_v10 = vld [vmem:[%s1001_s0 + $0x10] sm:$0xff]  ;;  %v378_v22 = vlaneseq }
   0x9   :  { %657 = vmatpush3.bf16.msra.mxu0 %v654_v7  ;;  %v30_v9 = vld [vmem:[%s1001_s0 + $0x48] sm:$0xff]  ;;  %v31_v11 = vld [vmem:[%s1001_s0 + $0x50] sm:$0xff]  ;;  %v24_v12 = vld [vmem:[%s1001_s0 + $0x18] sm:$0xff] }
   0xa   :  { %661 = vmatpush3.bf16.msra.mxu1 %v654_v7  ;;  %v32_v13 = vld [vmem:[%s1001_s0 + $0x58] sm:$0xff]  ;;  %v25_v14 = vld [vmem:[%s1001_s0 + $0x20] sm:$0xff]  ;;  %v26_v16 = vld [vmem:[%s1001_s0 + $0x28] sm:$0xff]  ;;  %v379_v23 = vand.u32 127, %v378_v22 }
   0xb   :  { %v33_v15 = vld [vmem:[%s1001_s0 + $0x60] sm:$0xff]  ;;  %v34_v17 = vld [vmem:[%s1001_s0 + $0x68] sm:$0xff]  ;;  %v27_v18 = vld [vmem:[%s1001_s0 + $0x30] sm:$0xff] }
   0xc   :  { %627 = vmatmul.mubr.msk.f32.vlgmr.msra.gmra.mrb[0].mxu0 %vm41_vm0, %v22_v8  ;;  %v35_v19 = vld [vmem:[%s1001_s0 + $0x70] sm:$0xff]  ;;  %v28_v20 = vld [vmem:[%s1001_s0 + $0x38] sm:$0xff]  ;;  %vm380_vm1 = vcmp.eq.s32.totalorder %v379_v23, 16  ;;  %v806_v24 = vld [vmem:[%s1003_s2] ss:$0 sm:$0xff]  ;;  %s689_s2 = smov [#allocation2]  }
   0xd   :  { %639 = vmatmul.mubr.msk.f32.vlgmr.msra.gmra.mrb[0].mxu1 %vm41_vm0, %v30_v9  ;;  %629 = vmatprep.mubr.msk.f32.mxu0 %vm41_vm0, %v23_v10  ;;  %v36_v21 = vld [vmem:[%s1001_s0 + $0x78] sm:$0xff]  ;;  %v817_v35 = vld [vmem:[%s1004_s3] ss:$0 sm:$0xff]  ;;  %s482_s3 = sshll.u32 %s689_s2, 4  ;;  %s483_s3 = int_to_ptr.vmem [resolvable:$true] %s482_s3 }
   0xe   :  { %641 = vmatprep.mubr.msk.f32.mxu1 %vm41_vm0, %v31_v11  ;;  %s665_s14 = scalar_lea.vmem %s483_s3, 1024  ;;  %p670_p1 = scmp.lt.s32.totalorder %s483_s3, %s483_s3 }
   0xf   :  { %p666_p0 = scmp.ne.s32.totalorder %s483_s3, %s665_s14  ;;  %p671_p2 = scmp.lt.s32.totalorder %s665_s14, %s665_s14 }
  0x10   :  { %630 = vmatmul.mubr.msk.f32.gmra.mrb[2].mxu0 %vm41_vm0, %v24_v12 }
  0x11   :  { %642 = vmatmul.mubr.msk.f32.gmra.mrb[2].mxu1 %vm41_vm0, %v32_v13  ;;  %632 = vmatprep.mubr.msk.f32.mxu0 %vm41_vm0, %v25_v14  ;;  %p672_p3 = por %p671_p2, %p670_p1 }
  0x12   :  { %644 = vmatprep.mubr.msk.f32.mxu1 %vm41_vm0, %v33_v15 }
  0x13   :  { %p673_p4 = pnand %p672_p3, %p666_p0 }
  0x14   :  { %633 = vmatmul.mubr.msk.f32.gmra.mrb[4].mxu0 %vm41_vm0, %v26_v16 }
  0x15   :  { %645 = vmatmul.mubr.msk.f32.gmra.mrb[4].mxu1 %vm41_vm0, %v34_v17  ;;  %635 = vmatprep.mubr.msk.f32.mxu0 %vm41_vm0, %v27_v18 }
  0x16   :  { %647 = vmatprep.mubr.msk.f32.mxu1 %vm41_vm0, %v35_v19 }
  0x18   :  { %636 = vmatmul.mubr.msk.f32.gmra.mrb[6].mxu0 %vm41_vm0, %v28_v20 }
  0x19   :  { %648 = vmatmul.mubr.msk.f32.gmra.mrb[6].mxu1 %vm41_vm0, %v36_v21 }
  0xdf   :  { %v628_v25 = vpop.f32.mrb[0].mxu0 }
  0xe0   :  { %v640_v26 = vpop.f32.mrb[0].mxu1  ;;  %v382_v27 = vsel %vm380_vm1, 1.0, %v628_v25  ;;  %v156_v29 = vpop.f32.mrb[1].mxu0  ;;  %v243_v32 = vmul.f32 %v628_v25, %v806_v24  ;;  %v315_v40 = vmul.f32 %v628_v25, %v817_v35 }
  0xe1   :  { %v390_v28 = vsel %vm380_vm1, 1.0, %v640_v26  ;;  %v196_v30 = vpop.f32.mrb[1].mxu1  ;;  %v251_v31 = vmul.f32 %v640_v26, %v806_v24  ;;  %v381_v33 = vsel %vm380_vm1, 1.0, %v156_v29  ;;  %v242_v41 = vmul.f32 %v806_v24, %v156_v29 }
  0xe2   :  { %v389_v34 = vsel %vm380_vm1, 1.0, %v196_v30  ;;  %v554_v36 = vpack.c.bf16 %v382_v27, %v381_v33  ;;  %260 = vadd.xlane.f32.xlu0 %v243_v32  ;;  %v323_v52 = vmul.f32 %v640_v26, %v817_v35  ;;  %v250_v53 = vmul.f32 %v806_v24, %v196_v30 }
  0xe3   :  { %v574_v37 = vpack.c.bf16 %v390_v28, %v389_v34  ;;  %276 = vadd.xlane.f32.xlu1 %v251_v31  ;;  %v631_v38 = vpop.f32.mrb[2].mxu0  ;;  %v314_v1 = vmul.f32 %v817_v35, %v156_v29  ;;  %v322_v11 = vmul.f32 %v817_v35, %v196_v30 }
  0xe4   :  { %v643_v39 = vpop.f32.mrb[2].mxu1  ;;  %555 = vst [vmem:[#allocation2] sm:$0xff] %v554_v36   ;;  %v384_v42 = vsel %vm380_vm1, 1.0, %v631_v38  ;;  %v166_v43 = vpop.f32.mrb[3].mxu0  ;;  %v245_v60 = vmul.f32 %v631_v38, %v806_v24  ;;  %v317_v13 = vmul.f32 %v631_v38, %v817_v35 }
  0xe5   :  { %594 = vst [vmem:[#allocation2 + $0x20] sm:$0xff] %v574_v37   ;;  %v392_v44 = vsel %vm380_vm1, 1.0, %v643_v39  ;;  %v206_v45 = vpop.f32.mrb[3].mxu1  ;;  %v383_v46 = vsel %vm380_vm1, 1.0, %v166_v43  ;;  %v253_v8 = vmul.f32 %v643_v39, %v806_v24  ;;  %v325_v14 = vmul.f32 %v643_v39, %v817_v35 }
  0xe6   :  { %v391_v47 = vsel %vm380_vm1, 1.0, %v206_v45  ;;  %258 = vadd.xlane.f32.xlu0 %v242_v41  ;;  %v559_v48 = vpack.c.bf16 %v384_v42, %v383_v46  ;;  %v252_v12 = vmul.f32 %v806_v24, %v206_v45  ;;  %v316_v15 = vmul.f32 %v817_v35, %v166_v43 }
  0xe7   :  { %332 = vadd.xlane.f32.xlu1 %v315_v40  ;;  %v579_v49 = vpack.c.bf16 %v392_v44, %v391_v47  ;;  %v634_v50 = vpop.f32.mrb[4].mxu0  ;;  %v324_v16 = vmul.f32 %v817_v35, %v206_v45  ;;  %v244_v17 = vmul.f32 %v806_v24, %v166_v43 }
  0xe8   :  { %v646_v51 = vpop.f32.mrb[4].mxu1  ;;  %591 = vst [vmem:[#allocation2 + $0x8] sm:$0xff] %v559_v48   ;;  %v386_v54 = vsel %vm380_vm1, 1.0, %v634_v50  ;;  %v176_v55 = vpop.f32.mrb[5].mxu0  ;;  %v247_v18 = vmul.f32 %v634_v50, %v806_v24  ;;  %v319_v22 = vmul.f32 %v634_v50, %v817_v35 }
  0xe9   :  { %595 = vst [vmem:[#allocation2 + $0x28] sm:$0xff] %v579_v49   ;;  %v394_v56 = vsel %vm380_vm1, 1.0, %v646_v51  ;;  %v216_v57 = vpop.f32.mrb[5].mxu1  ;;  %v385_v58 = vsel %vm380_vm1, 1.0, %v176_v55  ;;  %v246_v19 = vmul.f32 %v806_v24, %v176_v55  ;;  %v255_v20 = vmul.f32 %v646_v51, %v806_v24 }
  0xea   :  { %v393_v59 = vsel %vm380_vm1, 1.0, %v216_v57  ;;  %274 = vadd.xlane.f32.xlu0 %v250_v53  ;;  %v564_v61 = vpack.c.bf16 %v386_v54, %v385_v58  ;;  %v254_v21 = vmul.f32 %v806_v24, %v216_v57  ;;  %v318_v23 = vmul.f32 %v817_v35, %v176_v55 }
  0xeb   :  { %348 = vadd.xlane.f32.xlu1 %v323_v52  ;;  %v584_v62 = vpack.c.bf16 %v394_v56, %v393_v59  ;;  %v637_v63 = vpop.f32.mrb[6].mxu0  ;;  %v327_v25 = vmul.f32 %v646_v51, %v817_v35  ;;  %v326_v26 = vmul.f32 %v817_v35, %v216_v57 }
  0xec   :  { %v649_v0 = vpop.f32.mrb[6].mxu1  ;;  %592 = vst [vmem:[#allocation2 + $0x10] sm:$0xff] %v564_v61   ;;  %v388_v2 = vsel %vm380_vm1, 1.0, %v637_v63  ;;  %v186_v3 = vpop.f32.mrb[7].mxu0  ;;  %v249_v27 = vmul.f32 %v637_v63, %v806_v24  ;;  %v321_v31 = vmul.f32 %v637_v63, %v817_v35 }
  0xed   :  { %596 = vst [vmem:[#allocation2 + $0x30] sm:$0xff] %v584_v62   ;;  %v396_v4 = vsel %vm380_vm1, 1.0, %v649_v0  ;;  %v226_v5 = vpop.f32.mrb[7].mxu1  ;;  %v387_v6 = vsel %vm380_vm1, 1.0, %v186_v3  ;;  %v248_v28 = vmul.f32 %v806_v24, %v186_v3  ;;  %v257_v29 = vmul.f32 %v649_v0, %v806_v24 }
  0xee   :  { %v395_v7 = vsel %vm380_vm1, 1.0, %v226_v5  ;;  %330 = vadd.xlane.f32.xlu0 %v314_v1  ;;  %v569_v9 = vpack.c.bf16 %v388_v2, %v387_v6  ;;  %v256_v30 = vmul.f32 %v806_v24, %v226_v5  ;;  %v320_v32 = vmul.f32 %v817_v35, %v186_v3 }
  0xef   :  { %264 = vadd.xlane.f32.xlu1 %v245_v60  ;;  %v589_v10 = vpack.c.bf16 %v396_v4, %v395_v7  ;;  %v329_v33 = vmul.f32 %v649_v0, %v817_v35  ;;  %v328_v34 = vmul.f32 %v817_v35, %v226_v5 }
  0xf0   :  { %593 = vst [vmem:[#allocation2 + $0x18] sm:$0xff] %v569_v9  }
  0xf1   :  { %597 = vst [vmem:[#allocation2 + $0x38] sm:$0xff] %v589_v10  }
  0xf2   :  { %346 = vadd.xlane.f32.xlu0 %v322_v11 }
  0xf3   :  { %280 = vadd.xlane.f32.xlu1 %v253_v8 }
  0xf6   :  { %278 = vadd.xlane.f32.xlu0 %v252_v12 }
  0xf7   :  { %336 = vadd.xlane.f32.xlu1 %v317_v13 }
  0xfa   :  { %334 = vadd.xlane.f32.xlu0 %v316_v15 }
  0xfb   :  { %352 = vadd.xlane.f32.xlu1 %v325_v14 }
  0xfe   :  { %350 = vadd.xlane.f32.xlu0 %v324_v16 }
  0xff   :  { %262 = vadd.xlane.f32.xlu1 %v244_v17 }
 0x102   :  { %266 = vadd.xlane.f32.xlu0 %v246_v19 }
 0x103   :  { %268 = vadd.xlane.f32.xlu1 %v247_v18 }
 0x106   :  { %282 = vadd.xlane.f32.xlu0 %v254_v21 }
 0x107   :  { %284 = vadd.xlane.f32.xlu1 %v255_v20 }
 0x10a   :  { %338 = vadd.xlane.f32.xlu0 %v318_v23 }
 0x10b   :  { %340 = vadd.xlane.f32.xlu1 %v319_v22 }
 0x10e   :  { %354 = vadd.xlane.f32.xlu0 %v326_v26 }
 0x10f   :  { %356 = vadd.xlane.f32.xlu1 %v327_v25 }
 0x112   :  { %270 = vadd.xlane.f32.xlu0 %v248_v28 }
 0x113   :  { %272 = vadd.xlane.f32.xlu1 %v249_v27 }
 0x116   :  { %286 = vadd.xlane.f32.xlu0 %v256_v30 }
 0x117   :  { %288 = vadd.xlane.f32.xlu1 %v257_v29 }
 0x11a   :  { %342 = vadd.xlane.f32.xlu0 %v320_v32 }
 0x11b   :  { %344 = vadd.xlane.f32.xlu1 %v321_v31 }
 0x11e   :  { %358 = vadd.xlane.f32.xlu0 %v328_v34 }
 0x11f   :  { %360 = vadd.xlane.f32.xlu1 %v329_v33 }
 0x120   :  { %676 = shalt.err (!%p673_p4)
}
 0x121   :  { %s677_s17 = scalar_lea.hbm %s1005_s4, 1024 }
 0x122   :  { %p678_p5 = scmp.ne.s32.totalorder %s1005_s4, %s677_s17  ;;  %p681_p6 = scmp.lt.u32.totalorder %s677_s17, %s1005_s4 }
 0x124   :  { %p683_p7 = pnand %p681_p6, %p678_p5 }
 0x126   :  { %686 = shalt.err (!%p683_p7)
}
 0x127   :  { %s690_s22 = smov 64   ;;  %s691_s23 = smov 4   ;;  %vm290_vm2 = vcmask 7168  }
 0x128   :  { %488 = dma.vmem_to_hbm [thread:$0]  %s483_s3, 1024, %s1005_s4, [#allocation3], %s690_s22, %s690_s22, %s691_s23  }
 0x16f   :  { %v261_v35 = vpop.xlane.xlu0 %260 }
 0x170   :  { %v277_v24 = vpop.xlane.xlu1 %276  ;;  %292 = vst.msk [vmem:[%s1006_s5 + $0x8] sm:$0xff] %vm290_vm2, %v261_v35 }
 0x171   :  { %300 = vst.msk [vmem:[%s1006_s5 + $0x48] sm:$0xff] %vm290_vm2, %v277_v24 }
 0x173   :  { %v259_v37 = vpop.xlane.xlu0 %258 }
 0x174   :  { %v333_v36 = vpop.xlane.xlu1 %332  ;;  %291 = vst.msk [vmem:[%s1006_s5] sm:$0xff] %vm290_vm2, %v259_v37 }
 0x175   :  { %363 = vst.msk [vmem:[%s1007_s6 + $0x8] sm:$0xff] %vm290_vm2, %v333_v36 }
 0x177   :  { %v275_v39 = vpop.xlane.xlu0 %274 }
 0x178   :  { %v349_v38 = vpop.xlane.xlu1 %348  ;;  %299 = vst.msk [vmem:[%s1006_s5 + $0x40] sm:$0xff] %vm290_vm2, %v275_v39 }
 0x179   :  { %371 = vst.msk [vmem:[%s1007_s6 + $0x48] sm:$0xff] %vm290_vm2, %v349_v38 }
 0x17b   :  { %v331_v40 = vpop.xlane.xlu0 %330 }
 0x17c   :  { %v265_v41 = vpop.xlane.xlu1 %264  ;;  %362 = vst.msk [vmem:[%s1007_s6] sm:$0xff] %vm290_vm2, %v331_v40 }
 0x17d   :  { %294 = vst.msk [vmem:[%s1006_s5 + $0x18] sm:$0xff] %vm290_vm2, %v265_v41 }
 0x17f   :  { %v347_v42 = vpop.xlane.xlu0 %346 }
 0x180   :  { %v281_v43 = vpop.xlane.xlu1 %280  ;;  %370 = vst.msk [vmem:[%s1007_s6 + $0x40] sm:$0xff] %vm290_vm2, %v347_v42 }
 0x181   :  { %302 = vst.msk [vmem:[%s1006_s5 + $0x58] sm:$0xff] %vm290_vm2, %v281_v43 }
 0x183   :  { %v279_v44 = vpop.xlane.xlu0 %278 }
 0x184   :  { %v337_v45 = vpop.xlane.xlu1 %336  ;;  %301 = vst.msk [vmem:[%s1006_s5 + $0x50] sm:$0xff] %vm290_vm2, %v279_v44 }
 0x185   :  { %365 = vst.msk [vmem:[%s1007_s6 + $0x18] sm:$0xff] %vm290_vm2, %v337_v45 }
 0x187   :  { %v335_v47 = vpop.xlane.xlu0 %334 }
 0x188   :  { %v353_v46 = vpop.xlane.xlu1 %352  ;;  %364 = vst.msk [vmem:[%s1007_s6 + $0x10] sm:$0xff] %vm290_vm2, %v335_v47 }
 0x189   :  { %373 = vst.msk [vmem:[%s1007_s6 + $0x58] sm:$0xff] %vm290_vm2, %v353_v46 }
 0x18b   :  { %v351_v48 = vpop.xlane.xlu0 %350 }
 0x18c   :  { %v263_v49 = vpop.xlane.xlu1 %262  ;;  %372 = vst.msk [vmem:[%s1007_s6 + $0x50] sm:$0xff] %vm290_vm2, %v351_v48 }
 0x18d   :  { %293 = vst.msk [vmem:[%s1006_s5 + $0x10] sm:$0xff] %vm290_vm2, %v263_v49 }
 0x18f   :  { %v267_v51 = vpop.xlane.xlu0 %266 }
 0x190   :  { %v269_v50 = vpop.xlane.xlu1 %268  ;;  %295 = vst.msk [vmem:[%s1006_s5 + $0x20] sm:$0xff] %vm290_vm2, %v267_v51 }
 0x191   :  { %296 = vst.msk [vmem:[%s1006_s5 + $0x28] sm:$0xff] %vm290_vm2, %v269_v50 }
 0x193   :  { %v283_v53 = vpop.xlane.xlu0 %282 }
 0x194   :  { %v285_v52 = vpop.xlane.xlu1 %284  ;;  %303 = vst.msk [vmem:[%s1006_s5 + $0x60] sm:$0xff] %vm290_vm2, %v283_v53 }
 0x195   :  { %304 = vst.msk [vmem:[%s1006_s5 + $0x68] sm:$0xff] %vm290_vm2, %v285_v52 }
 0x197   :  { %v339_v55 = vpop.xlane.xlu0 %338 }
 0x198   :  { %v341_v54 = vpop.xlane.xlu1 %340  ;;  %366 = vst.msk [vmem:[%s1007_s6 + $0x20] sm:$0xff] %vm290_vm2, %v339_v55 }
 0x199   :  { %367 = vst.msk [vmem:[%s1007_s6 + $0x28] sm:$0xff] %vm290_vm2, %v341_v54 }
 0x19b   :  { %v355_v57 = vpop.xlane.xlu0 %354 }
 0x19c   :  { %v357_v56 = vpop.xlane.xlu1 %356  ;;  %374 = vst.msk [vmem:[%s1007_s6 + $0x60] sm:$0xff] %vm290_vm2, %v355_v57 }
 0x19d   :  { %375 = vst.msk [vmem:[%s1007_s6 + $0x68] sm:$0xff] %vm290_vm2, %v357_v56 }
 0x19f   :  { %v271_v59 = vpop.xlane.xlu0 %270 }
 0x1a0   :  { %v273_v58 = vpop.xlane.xlu1 %272  ;;  %297 = vst.msk [vmem:[%s1006_s5 + $0x30] sm:$0xff] %vm290_vm2, %v271_v59 }
 0x1a1   :  { %298 = vst.msk [vmem:[%s1006_s5 + $0x38] sm:$0xff] %vm290_vm2, %v273_v58 }
 0x1a3   :  { %v287_v61 = vpop.xlane.xlu0 %286 }
 0x1a4   :  { %v289_v60 = vpop.xlane.xlu1 %288  ;;  %305 = vst.msk [vmem:[%s1006_s5 + $0x70] sm:$0xff] %vm290_vm2, %v287_v61 }
 0x1a5   :  { %306 = vst.msk [vmem:[%s1006_s5 + $0x78] sm:$0xff] %vm290_vm2, %v289_v60 }
 0x1a7   :  { %v343_v63 = vpop.xlane.xlu0 %342 }
 0x1a8   :  { %v345_v62 = vpop.xlane.xlu1 %344  ;;  %368 = vst.msk [vmem:[%s1007_s6 + $0x30] sm:$0xff] %vm290_vm2, %v343_v63 }
 0x1a9   :  { %369 = vst.msk [vmem:[%s1007_s6 + $0x38] sm:$0xff] %vm290_vm2, %v345_v62 }
 0x1ab   :  { %v359_v1 = vpop.xlane.xlu0 %358 }
 0x1ac   :  { %v361_v0 = vpop.xlane.xlu1 %360  ;;  %376 = vst.msk [vmem:[%s1007_s6 + $0x70] sm:$0xff] %vm290_vm2, %v359_v1 }
 0x1ad   :  { %377 = vst.msk [vmem:[%s1007_s6 + $0x78] sm:$0xff] %vm290_vm2, %v361_v0 }
 0x1ae   :  { %687 = dma.done.wait [#allocation3], 1024  }
 0x1af   :  { %688 = vsyncadd [#allocation3], 4294966272 }
 0x1b0   :  { %500 = vsyncpa [#allocation3], 1 }

</bundles_post_ra>
